<compile_context>
chip_gen: v7x
topology: tpu7x:2x2x1
jax: 0.10.0
libtpu: 0.0.40
codegen_flags: <defaults>
</compile_context>

<pallas_src>
import functools

import jax
import jax.numpy as jnp
from jax import lax
from jax.experimental import pallas as pl
from jax.experimental.pallas import tpu as pltpu


def _contrastive_kernel(o1_ref, o2_ref, t_ref, out_ref, *,
                        margin, eps, total_b, block_b, needs_mask):
    # o1_ref, o2_ref : (TB, D) embeddings in input dtype
    # t_ref          : (TB, 1) target (0 = similar, 1 = dissimilar)
    # out_ref        : (1, 1)  f32 accumulator, resident across the whole grid
    i = pl.program_id(0)
    nblocks = pl.num_programs(0)

    @pl.when(i == 0)
    def _init():
        out_ref[...] = jnp.zeros_like(out_ref)

    o1 = o1_ref[...]
    o2 = o2_ref[...]
    if o1.dtype == jnp.float32:
        diff = (o1 - o2) + eps                               # f32 path (v5e-safe)
    else:
        # bf16/fp16: subtract on the VPU in the native dtype, upcast only for the
        # square-accumulate (halves the (TB, D) temporary footprint on v6e/v7x).
        diff = (o1 - o2).astype(jnp.float32) + eps

    t = t_ref[...].astype(jnp.float32)                       # (TB, 1)
    d2 = jnp.sum(diff * diff, axis=-1, keepdims=True)        # (TB, 1) squared distance
    d = jnp.sqrt(d2)                                         # needed only for margin term

    pos = (1.0 - t) * d2                                     # (1 - target) * d^2
    neg = t * jnp.square(jnp.maximum(margin - d, 0.0))       # target * clamp(margin - d, 0)^2
    per_sample = pos + neg                                    # (TB, 1)

    if needs_mask:
        # Only the last block is ragged: mask there, plain sum everywhere else.
        @pl.when(i == nblocks - 1)
        def _accumulate_masked():
            row = lax.broadcasted_iota(jnp.int32, per_sample.shape, 0) + i * block_b
            masked = jnp.where(row < total_b, per_sample, 0.0)
            out_ref[...] += jnp.sum(masked, axis=0, keepdims=True)

        @pl.when(i != nblocks - 1)
        def _accumulate_full():
            out_ref[...] += jnp.sum(per_sample, axis=0, keepdims=True)
    else:
        out_ref[...] += jnp.sum(per_sample, axis=0, keepdims=True)

    # Finalize the mean in-kernel (no wrapper-side reduction launch).
    @pl.when(i == nblocks - 1)
    def _finalize():
        out_ref[...] = out_ref[...] * (1.0 / total_b)


def _vmem_budgets():
    """(tile_budget_bytes, vmem_limit_bytes).

    Conservative default is safe on v7x (64 MiB / TC); bumped when we can positively
    identify a 128 MiB-VMEM generation (v5e/v5p/v6e)."""
    tile_budget, vmem_limit = 24 << 20, 48 << 20
    try:
        kind = jax.devices()[0].device_kind.lower()
        if ("v5" in kind) or ("v6" in kind):
            tile_budget, vmem_limit = 48 << 20, 96 << 20
    except Exception:
        pass
    return tile_budget, vmem_limit


def _choose_block_b(batch, feat, in_itemsize, tile_budget):
    """Largest batch tile whose live VMEM (streamed tiles + f32 temporaries) fits budget."""
    lane_feat = ((feat + 127) // 128) * 128        # lane padding of the last dim
    # 2 inputs x 2 pipeline buffers in the input dtype  +  ~3 f32-wide temporaries
    per_row = lane_feat * (2 * 2 * in_itemsize + 3 * 4)
    tb = tile_budget // max(per_row, 1)
    tb = max(8, (tb // 8) * 8)                      # sublane alignment
    b_pad = ((batch + 7) // 8) * 8
    return min(tb, b_pad)


def contrastive_loss(output1, output2, target, margin=1.0):
    """Pallas TPU implementation of ContrastiveLoss.forward.

    output1, output2: (B, D) embeddings (f32 / bf16 / fp16)
    target:           (B,)   0 = similar pair, 1 = dissimilar pair
    returns scalar f32 loss.
    """
    B, D = output1.shape
    itemsize = jnp.dtype(output1.dtype).itemsize
    t = jnp.asarray(target, jnp.float32).reshape(B, 1)

    tile_budget, vmem_limit = _vmem_budgets()
    TB = _choose_block_b(B, D, itemsize, tile_budget)
    nblocks = (B + TB - 1) // TB
    needs_mask = (B % TB) != 0

    kernel = functools.partial(
        _contrastive_kernel,
        margin=float(margin),
        eps=1e-6,
        total_b=B,
        block_b=TB,
        needs_mask=needs_mask,
    )

    result = pl.pallas_call(
        kernel,
        out_shape=jax.ShapeDtypeStruct((1, 1), jnp.float32),
        grid=(nblocks,),
        in_specs=[
            pl.BlockSpec((TB, D), lambda i: (i, 0)),
            pl.BlockSpec((TB, D), lambda i: (i, 0)),
            pl.BlockSpec((TB, 1), lambda i: (i, 0)),
        ],
        # Accumulator: same (full-array) block for every grid step -> stays resident
        # in VMEM across the reduction axis; written back once at the end.
        out_specs=pl.BlockSpec((1, 1), lambda i: (0, 0)),
        compiler_params=pltpu.CompilerParams(
            dimension_semantics=("arbitrary",),
            vmem_limit_bytes=vmem_limit,
        ),
        cost_estimate=pl.CostEstimate(
            flops=int(4 * B * D + 10 * B),
            transcendentals=int(B),
            bytes_accessed=int(2 * B * D * itemsize + 4 * B + 4),
        ),
    )(output1, output2, t)

    return result[0, 0]


def _reference_loss(output1, output2, target, margin=1.0, eps=1e-6):
    o1 = output1.astype(jnp.float32)
    o2 = output2.astype(jnp.float32)
    diff = o1 - o2 + eps
    d = jnp.sqrt(jnp.sum(diff * diff, axis=-1))
    pos = (1.0 - target) * d**2
    neg = target * jnp.square(jnp.maximum(margin - d, 0.0))
    return jnp.mean(pos + neg)


if __name__ == "__main__":
    key = jax.random.PRNGKey(0)
    k1, k2, k3, k4, k5, k6 = jax.random.split(key, 6)

    # Small embedding batch consistent with a siamese head.
    B, D = 8, 32
    output1 = jax.random.normal(k1, (B, D), dtype=jnp.float32)
    output2 = jax.random.normal(k2, (B, D), dtype=jnp.float32)
    target = jax.random.bernoulli(k3, p=0.5, shape=(B,)).astype(jnp.float32)

    loss = jax.block_until_ready(contrastive_loss(output1, output2, target, margin=1.0))
    ref = _reference_loss(output1, output2, target, margin=1.0)
    assert jnp.allclose(loss, ref, rtol=1e-5, atol=1e-5), (loss, ref)

    # Ragged batch (not a multiple of 8) to exercise the last-block mask.
    Br = 10
    o1r = jax.random.normal(k4, (Br, D), dtype=jnp.float32)
    o2r = jax.random.normal(k5, (Br, D), dtype=jnp.float32)
    tr = jax.random.bernoulli(k6, p=0.5, shape=(Br,)).astype(jnp.float32)
    loss_r = jax.block_until_ready(contrastive_loss(o1r, o2r, tr, margin=1.0))
    ref_r = _reference_loss(o1r, o2r, tr, margin=1.0)
    assert jnp.allclose(loss_r, ref_r, rtol=1e-5, atol=1e-5), (loss_r, ref_r)

    print("KERNEL_OK")
</pallas_src>

<mosaic_0001>
module attributes {stable_mosaic.version = 11 : i64} {
  func.func @_contrastive_kernel(%arg0: i32, %arg1: memref<8x32xf32, #tpu.memory_space<vmem>>, %arg2: memref<8x32xf32, #tpu.memory_space<vmem>>, %arg3: memref<8x1xf32, #tpu.memory_space<vmem>>, %arg4: memref<1x1xf32, #tpu.memory_space<vmem>>) attributes {dimension_semantics = [#tpu.dimension_semantics<arbitrary>], iteration_bounds = array<i64: 1>, scalar_prefetch = 0 : i64, scratch_operands = 0 : i64, tpu.core_type = #tpu.core_type<tc>, window_params = [{transform_indices = @transform_0, window_bounds = array<i64: 8, 32>}, {transform_indices = @transform_1, window_bounds = array<i64: 8, 32>}, {transform_indices = @transform_2, window_bounds = array<i64: 8, 1>}, {pipeline_mode = #tpu.pipeline_mode<synchronous>, transform_indices = @transform_3, window_bounds = array<i64: 1, 1>}]} {
    %c0_i32 = arith.constant 0 : i32
    %0 = arith.cmpi eq, %arg0, %c0_i32 : i32
    %1 = arith.extui %0 : i1 to i32
    %c0_i32_0 = arith.constant 0 : i32
    %2 = arith.cmpi ne, %1, %c0_i32_0 : i32
    scf.if %2 {
      %cst_17 = arith.constant 0.000000e+00 : f32
      %31 = vector.broadcast %cst_17 : f32 to vector<1x1xf32>
      %c0_18 = arith.constant 0 : index
      %c0_19 = arith.constant 0 : index
      %32 = vector.load %arg4[%c0_18, %c0_19] : memref<1x1xf32, #tpu.memory_space<vmem>>, vector<1x1xf32>
      tpu.vector_store %arg4[%c0_18, %c0_19], %31 {strides = array<i32>} : memref<1x1xf32, #tpu.memory_space<vmem>>, vector<1x1xf32>,
    } else {
    }
    %c0 = arith.constant 0 : index
    %c0_1 = arith.constant 0 : index
    %3 = vector.load %arg1[%c0, %c0_1] : memref<8x32xf32, #tpu.memory_space<vmem>>, vector<8x32xf32>
    %c0_2 = arith.constant 0 : index
    %c0_3 = arith.constant 0 : index
    %4 = vector.load %arg2[%c0_2, %c0_3] : memref<8x32xf32, #tpu.memory_space<vmem>>, vector<8x32xf32>
    %5 = arith.subf %3, %4 : vector<8x32xf32>
    %cst = arith.constant 9.99999997E-7 : f32
    %6 = vector.broadcast %cst : f32 to vector<8x32xf32>
    %7 = arith.addf %5, %6 : vector<8x32xf32>
    %c0_4 = arith.constant 0 : index
    %c0_5 = arith.constant 0 : index
    %8 = vector.load %arg3[%c0_4, %c0_5] : memref<8x1xf32, #tpu.memory_space<vmem>>, vector<8x1xf32>
    %9 = arith.mulf %7, %7 : vector<8x32xf32>
    %cst_6 = arith.constant dense<0.000000e+00> : vector<8xf32>
    %10 = vector.multi_reduction <add>, %9, %cst_6 [1] : vector<8x32xf32> to vector<8xf32>
    %11 = vector.shape_cast %10 : vector<8xf32> to vector<8x1xf32>
    %12 = math.sqrt %11 : vector<8x1xf32>
    %cst_7 = arith.constant 1.000000e+00 : f32
    %13 = vector.broadcast %cst_7 : f32 to vector<8x1xf32>
    %14 = arith.subf %13, %8 : vector<8x1xf32>
    %15 = arith.mulf %14, %11 : vector<8x1xf32>
    %cst_8 = arith.constant 1.000000e+00 : f32
    %16 = vector.broadcast %cst_8 : f32 to vector<8x1xf32>
    %17 = arith.subf %16, %12 : vector<8x1xf32>
    %cst_9 = arith.constant 0.000000e+00 : f32
    %18 = vector.broadcast %cst_9 : f32 to vector<8x1xf32>
    %19 = arith.maximumf %17, %18 : vector<8x1xf32>
    %20 = arith.mulf %19, %19 : vector<8x1xf32>
    %21 = arith.mulf %8, %20 : vector<8x1xf32>
    %22 = arith.addf %15, %21 : vector<8x1xf32>
    %c0_10 = arith.constant 0 : index
    %c0_11 = arith.constant 0 : index
    %23 = vector.load %arg4[%c0_10, %c0_11] : memref<1x1xf32, #tpu.memory_space<vmem>>, vector<1x1xf32>
    %cst_12 = arith.constant dense<0.000000e+00> : vector<1xf32>
    %24 = vector.multi_reduction <add>, %22, %cst_12 [0] : vector<8x1xf32> to vector<1xf32>
    %25 = vector.shape_cast %24 : vector<1xf32> to vector<1x1xf32>
    %26 = arith.addf %23, %25 : vector<1x1xf32>
    %c0_13 = arith.constant 0 : index
    %c0_14 = arith.constant 0 : index
    %27 = vector.load %arg4[%c0_13, %c0_14] : memref<1x1xf32, #tpu.memory_space<vmem>>, vector<1x1xf32>
    tpu.vector_store %arg4[%c0_13, %c0_14], %26 {strides = array<i32>} : memref<1x1xf32, #tpu.memory_space<vmem>>, vector<1x1xf32>,
    %c0_i32_15 = arith.constant 0 : i32
    %28 = arith.cmpi eq, %arg0, %c0_i32_15 : i32
    %29 = arith.extui %28 : i1 to i32
    %c0_i32_16 = arith.constant 0 : i32
    %30 = arith.cmpi ne, %29, %c0_i32_16 : i32
    scf.if %30 {
      %c0_17 = arith.constant 0 : index
      %c0_18 = arith.constant 0 : index
      %31 = vector.load %arg4[%c0_17, %c0_18] : memref<1x1xf32, #tpu.memory_space<vmem>>, vector<1x1xf32>
      %cst_19 = arith.constant 1.250000e-01 : f32
      %32 = vector.broadcast %cst_19 : f32 to vector<1x1xf32>
      %33 = arith.mulf %31, %32 : vector<1x1xf32>
      %c0_20 = arith.constant 0 : index
      %c0_21 = arith.constant 0 : index
      %34 = vector.load %arg4[%c0_20, %c0_21] : memref<1x1xf32, #tpu.memory_space<vmem>>, vector<1x1xf32>
      tpu.vector_store %arg4[%c0_20, %c0_21], %33 {strides = array<i32>} : memref<1x1xf32, #tpu.memory_space<vmem>>, vector<1x1xf32>,
    } else {
    }
    return
  }
  func.func @transform_0(%arg0: i32) -> (i32, i32) {
    %c0_i32 = arith.constant 0 : i32
    %c0_i32_0 = arith.constant 0 : i32
    return %arg0, %c0_i32 : i32, i32
  }
  func.func @transform_1(%arg0: i32) -> (i32, i32) {
    %c0_i32 = arith.constant 0 : i32
    %c0_i32_0 = arith.constant 0 : i32
    return %arg0, %c0_i32 : i32, i32
  }
  func.func @transform_2(%arg0: i32) -> (i32, i32) {
    %c0_i32 = arith.constant 0 : i32
    %c0_i32_0 = arith.constant 0 : i32
    return %arg0, %c0_i32 : i32, i32
  }
  func.func @transform_3(%arg0: i32) -> (i32, i32) {
    %c0_i32 = arith.constant 0 : i32
    %c0_i32_0 = arith.constant 0 : i32
    %c0_i32_1 = arith.constant 0 : i32
    return %c0_i32, %c0_i32_0 : i32, i32
  }
}

</mosaic_0001>

<bundles_post_ra>
// kernel: tpu_custom_call.1
= control target key start
LH: loop header
LB: loop body
LE: loop exit
PB: predicated region body
PF: predicated region fallthrough
CT: control target
= control target key end

     0   :  { %8 = vsyncpa [#allocation3], 0  ;;  %s199_s0 = inlined_call_operand.vmem [shape: f32[8,32], index: 0, kind: input, shape index: {}]   ;;  %s200_s1 = inlined_call_operand.hbm [shape: f32[8,32], index: 1, kind: input, shape index: {}]   ;;  %s201_s2 = inlined_call_operand.vmem [shape: f32[8,1], index: 2, kind: input, shape index: {}]   ;;  %s202_s3 = inlined_call_operand.hbm [shape: f32[1,1], index: 3, kind: output, shape index: {}]  }
   0x1   :  { %9 = vsyncpa [#allocation4], 0  ;;  %s143_s12 = smov [#allocation2]   ;;  %s95_s16 = scalar_lea.hbm %s200_s1, 128 }
   0x2   :  { %s18_s13 = sshll.u32 %s143_s12, 4  ;;  %p96_p0 = scmp.ne.s32.totalorder %s200_s1, %s95_s16  ;;  %s19_s13 = int_to_ptr.vmem [resolvable:$true] %s18_s13 }
   0x3   :  { %p99_p1 = scmp.lt.u32.totalorder %s95_s16, %s200_s1 }
   0x5   :  { %p101_p2 = pnand %p99_p1, %p96_p0 }
   0x7   :  { %104 = shalt.err (!%p101_p2)
}
   0x8   :  { %s105_s21 = scalar_lea.vmem %s19_s13, 128  ;;  %p110_p4 = scmp.lt.s32.totalorder %s19_s13, %s19_s13 }
   0x9   :  { %p106_p3 = scmp.ne.s32.totalorder %s19_s13, %s105_s21  ;;  %p111_p5 = scmp.lt.s32.totalorder %s105_s21, %s105_s21 }
   0xb   :  { %p112_p6 = por %p111_p5, %p110_p4 }
   0xd   :  { %p113_p7 = pnand %p112_p6, %p106_p3 }
   0xf   :  { %116 = shalt.err (!%p113_p7)
}
  0x10   :  { %21 = dma.hbm_to_vmem [thread:$0]  %s200_s1, 128, %s19_s13, [#allocation3]  }
  0x11   :  { %139 = dma.done.wait [#allocation3], 128  }
  0x12   :  { %140 = vsyncadd [#allocation3], 4294967168  ;;  %v33_v0 = vld [vmem:[%s199_s0] sm:$0xff]  ;;  %vm39_vm0 = vcmask 261120   ;;  %vm31_vm1 = vcmask 0   ;;  %v144_v6 = vmov 0.0  }
  0x13   :  { %v34_v1 = vld [vmem:[#allocation2] sm:$0xff]  ;;  %32 = vst.msk [vmem:[#allocation5] sm:$0x1] %vm31_vm1, %v144_v6  ;;  %vm58_vm4 = vcmask 7168  }
  0x14   :  { %v35_v2 = vsub.f32 %v33_v0, %v34_v1  ;;  %v37_v12 = vld [vmem:[%s201_s2] sm:$0xff]  ;;  %s145_s2 = smov [#allocation5]  }
  0x15   :  { %v50_v15 = vsub.f32 1.0, %v37_v12  ;;  %s81_s26 = sshll.u32 %s145_s2, 4  ;;  %s82_s26 = int_to_ptr.vmem [resolvable:$true] %s81_s26 }
  0x16   :  { %v36_v3 = vadd.f32 1e-06, %v35_v2  ;;  %s117_s27 = scalar_lea.vmem %s82_s26, 16  ;;  %s121_s28 = scalar_lea.vmem %s82_s26, 32 }
  0x17   :  { %p118_p8 = scmp.ne.s32.totalorder %s82_s26, %s117_s27  ;;  %p122_p9 = scmp.lt.s32.totalorder %s82_s26, %s82_s26 }
  0x18   :  { %v38_v4 = vmul.f32 %v36_v3, %v36_v3  ;;  %p123_p10 = scmp.lt.s32.totalorder %s121_s28, %s117_s27 }
  0x1a   :  { %v40_v5 = vsel %vm39_vm0, %v38_v4, 0.0  ;;  %v57_v27 = vld [vmem:[#allocation5] sm:$0x1]  ;;  %p124_p11 = por %p123_p10, %p122_p9 }
  0x1b   :  { %41 = vadd.xlane.f32.xlu0 %v40_v5 }
  0x1c   :  { %p125_p12 = pnand %p124_p11, %p118_p8 }
  0xa8   :  { %v42_v7 = vpop.xlane.xlu0 %41 }
  0xa9   :  { %93 = vrsqrt.f32 %v42_v7  ;;  %vm45_vm2 = vcmp.eq.f32.partialorder %v42_v7, inf  ;;  %v48_v10 = vand.u32 2147483648, %v42_v7  ;;  %vm47_vm3 = vcmp.eq.f32.partialorder %v42_v7, 0.0 }
  0xaa   :  { %v51_v18 = vmul.f32 %v50_v15, %v42_v7 }
  0xb3   :  { %v94_v8 = vpop.eup %93 }
  0xb4   :  { %v44_v9 = vmul.f32 %v94_v8, %v42_v7 }
  0xb6   :  { %v46_v11 = vsel %vm45_vm2, %v42_v7, %v44_v9 }
  0xb7   :  { %v49_v13 = vsel %vm47_vm3, %v48_v10, %v46_v11 }
  0xb8   :  { %v52_v14 = vsub.f32 1.0, %v49_v13 }
  0xba   :  { %v53_v16 = vmax.f32 %v52_v14, 0.0 }
  0xbc   :  { %v54_v17 = vmul.f32 %v53_v16, %v53_v16 }
  0xbe   :  { %v55_v19 = vmul.f32 %v54_v17, %v37_v12 }
  0xc0   :  { %v56_v20 = vadd.f32 %v55_v19, %v51_v18 }
  0xc2   :  { %v59_v21 = vsel %vm58_vm4, %v56_v20, 0.0 }
  0xc3   :  { %v60_v22 = vrot.slane %v59_v21, 4 }
  0xc5   :  { %v61_v23 = vadd.f32 %v60_v22, %v59_v21 }
  0xc7   :  { %v62_v24 = vrot.slane %v61_v23, 2 }
  0xc9   :  { %v63_v25 = vadd.f32 %v62_v24, %v61_v23 }
  0xcb   :  { %v64_v26 = vrot.slane %v63_v25, 1 }
  0xcd   :  { %v65_v28 = vadd.f32 %v64_v26, %v63_v25 }
  0xcf   :  { %v66_v29 = vadd.f32 %v65_v28, %v57_v27 }
  0xd1   :  { %68 = vst.msk [vmem:[#allocation5] sm:$0x1] %vm31_vm1, %v66_v29 }
  0xd8   :  { %v72_v30 = vld [vmem:[#allocation5] sm:$0x1] }
  0xd9   :  { %v73_v31 = vmul.f32 0.125, %v72_v30 }
  0xdb   :  { %74 = vst.msk [vmem:[#allocation5] sm:$0x1] %vm31_vm1, %v73_v31 }
  0xdc   :  { %128 = shalt.err (!%p125_p12)
}
  0xdd   :  { %s129_s4 = scalar_lea.hbm %s202_s3, 16 }
  0xde   :  { %p130_p13 = scmp.ne.s32.totalorder %s202_s3, %s129_s4  ;;  %p133_p0 = scmp.lt.u32.totalorder %s129_s4, %s202_s3 }
  0xe0   :  { %p135_p1 = pnand %p133_p0, %p130_p13 }
  0xe2   :  { %138 = shalt.err (!%p135_p1)
}
  0xe3   :  { %84 = dma.vmem_to_hbm [thread:$0]  %s82_s26, 16, %s202_s3, [#allocation4]  }
  0xe4   :  { %141 = dma.done.wait [#allocation4], 16  }
  0xe5   :  { %142 = vsyncadd [#allocation4], 4294967280 }
  0xe6   :  { %88 = vsyncpa [#allocation3], 1 }
  0xe7   :  { %89 = vsyncpa [#allocation4], 1 }

</bundles_post_ra>
